<compile_context>
chip_gen: v6e
topology: v6e:2x2x1
jax: 0.10.0
libtpu: 0.0.40
codegen_flags: <defaults>
</compile_context>

<pallas_src>
import functools

import jax
import jax.numpy as jnp
from jax import lax
from jax.experimental import pallas as pl
from jax.experimental.pallas import tpu as pltpu

EPS = 1e-5


# ---------------------------------------------------------------------------
# Fused Pallas kernel
# ---------------------------------------------------------------------------
def _fused_up_kernel(x1p_ref, x2_ref, wt_ref, wbr_ref, su_ref, tu_ref,
                     sb_ref, tb_ref, out_ref, *, h_valid, w_valid, need_mask):
    # x1p_ref: (1, Hp, Wp, Cin)        bf16  whole low-res input (+1 halo), resident per n
    # x2_ref : (TM, 2, Wh, 2*Cbr)      bf16  bridge input tile, last dim packed (px, cbr)
    # wt_ref : (2, 2, Cin, 4*Cout)     bf16  deconv tap weights, cols packed (py, px, c)
    # wbr_ref: (2*Cbr, 2*Cout)         bf16  block-diag 1x1 conv weight (px passes through)
    # su/tu  : (1, 2*Cout)             f32   folded BN scale/shift (up branch)
    # sb/tb  : (1, 2*Cout)             f32   folded BN scale/shift (bridge)
    # out_ref: (TM, 2, Wh, 2*Cout)     f32   output tile, last dim packed (px, c)
    tm = x2_ref.shape[0]
    wh = x2_ref.shape[2]
    cin = x1p_ref.shape[3]
    c2 = out_ref.shape[3]                       # 2 * out_ch
    m0 = pl.multiple_of(pl.program_id(1) * tm, tm)

    # ---- up branch: strided deconv as 4 accumulating MXU matmuls ----------
    xrows = x1p_ref[0, pl.ds(m0, tm + 1), :, :]          # (TM+1, Wh+1, Cin)
    acc = None
    for dy in range(2):
        for dx in range(2):
            xt = xrows[dy:dy + tm, dx:dx + wh, :].reshape(tm * wh, cin)
            part = jnp.dot(xt, wt_ref[dy, dx],
                           preferred_element_type=jnp.float32)
            acc = part if acc is None else acc + part    # (TM*Wh, 2*c2) f32

    su = su_ref[...]
    tu = tu_ref[...]
    sb = sb_ref[...]
    tb = tb_ref[...]

    if need_mask:
        # F.pad region of the up branch must be exactly zero (pad happens
        # AFTER BN+ReLU in the reference module).
        idx = lax.broadcasted_iota(jnp.int32, (tm * wh, 1), 0)
        m_loc = idx // wh
        w_loc = idx - m_loc * wh
        valid = ((m0 + m_loc) < h_valid) & (w_loc < w_valid)

    for py in range(2):
        up = acc[:, py * c2:(py + 1) * c2]               # (TM*Wh, 2*Cout)
        up = jnp.maximum(up * su + tu, 0.0)
        if need_mask:
            up = jnp.where(valid, up, 0.0)

        xb = x2_ref[:, py, :, :].reshape(tm * wh, x2_ref.shape[3])
        br = jnp.dot(xb, wbr_ref[...], preferred_element_type=jnp.float32)
        br = jnp.maximum(br * sb + tb, 0.0)

        out_ref[:, py, :, :] = (up + br).reshape(tm, wh, c2)


# ---------------------------------------------------------------------------
# Parameter folding helpers (plain JAX, tiny tensors)
# ---------------------------------------------------------------------------
def _fold_bn(bias, gamma, beta, mean, var):
    s = gamma / jnp.sqrt(var + EPS)
    t = (bias - mean) * s + beta
    return s, t


def _build_deconv_taps(w_up):
    """ConvTranspose2d(k=3,s=2,p=1,op=1) -> per-tap (Cin, 4*Cout) matrices.

    Output phase (py,px) of out[2m+py, 2n+px] draws only from input taps
    (dy,dx) at in[m+dy, n+dx]; kernel index map: (phase,d) -> k in
    {(0,0):1, (1,0):2, (1,1):0} for rows and columns independently.
    Columns of the result are packed (py, px, c).
    """
    in_ch, out_ch, _, _ = w_up.shape            # PyTorch layout (in, out, kH, kW)
    kmap = {(0, 0): 1, (1, 0): 2, (1, 1): 0}
    w = jnp.zeros((2, 2, in_ch, 2, 2, out_ch), jnp.float32)
    for (py, dy), ky in kmap.items():
        for (px, dx), kx in kmap.items():
            w = w.at[dy, dx, :, py, px, :].set(w_up[:, :, ky, kx])
    return w.reshape(2, 2, in_ch, 4 * out_ch)


def _pick_tm(mtot, wh, cbr, cout):
    """Largest divisor of mtot keeping double-buffered blocks comfortably in VMEM."""
    def step_bytes(tm):
        rows = tm * 2 * wh
        io = 2 * rows * (2 * cbr * 2 + 2 * cout * 4)      # x2 (bf16) + out (f32), x2
        tmp = 8 * tm * wh * 2 * cout * 4                  # in-kernel f32 temporaries
        return io + tmp
    budget = 6 * 1024 * 1024
    best = 1
    for tm in range(1, mtot + 1):
        if mtot % tm == 0 and step_bytes(tm) <= budget and tm * 2 * wh <= 8192:
            best = tm
    return best


# ---------------------------------------------------------------------------
# Public wrapper (PyTorch-style NCHW in / NCHW out)
# ---------------------------------------------------------------------------
def up_forward(x1_nchw, x2_nchw, params):
    # Boundary layout changes kept to preserve the NCHW PyTorch interface.
    x1 = jnp.transpose(x1_nchw, (0, 2, 3, 1)).astype(jnp.float32)   # (N,H,W,Cin)
    x2 = jnp.transpose(x2_nchw, (0, 2, 3, 1)).astype(jnp.float32)   # (N,H2,W2,Cbr)
    N, H, W, cin = x1.shape
    _, H2, W2, cbr = x2.shape
    cout = params['w_up'].shape[1]

    # TODO(synk): odd H2/W2 (odd F.pad amounts) not supported by the phase-packed layout.
    assert H2 % 2 == 0 and W2 % 2 == 0
    assert H2 >= 2 * H and W2 >= 2 * W

    mtot, wh = H2 // 2, W2 // 2
    hp, wp = mtot + 1, wh + 1

    # low-res input with deconv halo (+ any F.pad region), bf16
    x1p = jnp.pad(x1, ((0, 0), (0, hp - H), (0, wp - W), (0, 0))).astype(jnp.bfloat16)
    # bridge input viewed byte-identically as (N*H2/2, 2, W2/2, 2*Cbr)
    x2v = x2.astype(jnp.bfloat16).reshape(N * mtot, 2, wh, 2 * cbr)

    # weights (bf16) and folded BN scale/shift (f32)
    w_taps = _build_deconv_taps(params['w_up']).astype(jnp.bfloat16)    # (2,2,Cin,4*Cout)
    wbr = jnp.transpose(params['w_br'][:, :, 0, 0], (1, 0))             # (Cbr, Cout)
    wbr2 = jnp.zeros((2, cbr, 2, cout), jnp.float32)
    wbr2 = wbr2.at[0, :, 0, :].set(wbr).at[1, :, 1, :].set(wbr)
    wbr2 = wbr2.reshape(2 * cbr, 2 * cout).astype(jnp.bfloat16)

    s_up, t_up = _fold_bn(params['b_up'], params['up_gamma'], params['up_beta'],
                          params['up_mean'], params['up_var'])
    s_br, t_br = _fold_bn(params['b_br'], params['br_gamma'], params['br_beta'],
                          params['br_mean'], params['br_var'])
    su2 = jnp.tile(s_up, 2)[None, :]
    tu2 = jnp.tile(t_up, 2)[None, :]
    sb2 = jnp.tile(s_br, 2)[None, :]
    tb2 = jnp.tile(t_br, 2)[None, :]

    tm = _pick_tm(mtot, wh, cbr, cout)
    nt = mtot // tm
    need_mask = (H2 != 2 * H) or (W2 != 2 * W)

    kernel = functools.partial(_fused_up_kernel,
                               h_valid=H, w_valid=W, need_mask=need_mask)

    in_specs = [
        pl.BlockSpec((1, hp, wp, cin), lambda n, t: (n, 0, 0, 0)),          # resident per n
        pl.BlockSpec((tm, 2, wh, 2 * cbr),
                     lambda n, t, nt=nt: (n * nt + t, 0, 0, 0)),
        pl.BlockSpec((2, 2, cin, 4 * cout), lambda n, t: (0, 0, 0, 0)),
        pl.BlockSpec((2 * cbr, 2 * cout), lambda n, t: (0, 0)),
        pl.BlockSpec((1, 2 * cout), lambda n, t: (0, 0)),
        pl.BlockSpec((1, 2 * cout), lambda n, t: (0, 0)),
        pl.BlockSpec((1, 2 * cout), lambda n, t: (0, 0)),
        pl.BlockSpec((1, 2 * cout), lambda n, t: (0, 0)),
    ]
    out_spec = pl.BlockSpec((tm, 2, wh, 2 * cout),
                            lambda n, t, nt=nt: (n * nt + t, 0, 0, 0))

    out5 = pl.pallas_call(
        kernel,
        out_shape=jax.ShapeDtypeStruct((N * mtot, 2, wh, 2 * cout), jnp.float32),
        grid=(N, nt),
        in_specs=in_specs,
        out_specs=out_spec,
        compiler_params=pltpu.CompilerParams(
            dimension_semantics=("parallel", "parallel"),
            vmem_limit_bytes=32 * 1024 * 1024),
    )(x1p, x2v, w_taps, wbr2, su2, tu2, sb2, tb2)

    out = out5.reshape(N, H2, W2, cout)          # zero-cost: same byte layout
    return jnp.transpose(out, (0, 3, 1, 2))      # back to NCHW


# ---------------------------------------------------------------------------
# Deterministic parameter init (shapes follow the PyTorch module __init__)
# ---------------------------------------------------------------------------
def init_params(key, in_ch, bridge_ch, out_ch):
    ks = jax.random.split(key, 12)
    return {
        'w_up': 0.1 * jax.random.normal(ks[0], (in_ch, out_ch, 3, 3), jnp.float32),
        'b_up': 0.1 * jax.random.normal(ks[1], (out_ch,), jnp.float32),
        'up_gamma': 1.0 + 0.1 * jax.random.normal(ks[2], (out_ch,), jnp.float32),
        'up_beta': 0.1 * jax.random.normal(ks[3], (out_ch,), jnp.float32),
        'up_mean': 0.1 * jax.random.normal(ks[4], (out_ch,), jnp.float32),
        'up_var': jax.random.uniform(ks[5], (out_ch,), jnp.float32, 0.5, 1.5),
        'w_br': 0.1 * jax.random.normal(ks[6], (out_ch, bridge_ch, 1, 1), jnp.float32),
        'b_br': 0.1 * jax.random.normal(ks[7], (out_ch,), jnp.float32),
        'br_gamma': 1.0 + 0.1 * jax.random.normal(ks[8], (out_ch,), jnp.float32),
        'br_beta': 0.1 * jax.random.normal(ks[9], (out_ch,), jnp.float32),
        'br_mean': 0.1 * jax.random.normal(ks[10], (out_ch,), jnp.float32),
        'br_var': jax.random.uniform(ks[11], (out_ch,), jnp.float32, 0.5, 1.5),
    }


# ---------------------------------------------------------------------------
# Pure-JAX reference (lax convolutions) for correctness checking
# ---------------------------------------------------------------------------
def ref_forward(x1, x2, p):
    def bn_relu(y, b, g, be, m, v):
        y = y + b[None, :, None, None]
        y = (y - m[None, :, None, None]) / jnp.sqrt(v[None, :, None, None] + EPS) \
            * g[None, :, None, None] + be[None, :, None, None]
        return jnp.maximum(y, 0.0)

    w_t = jnp.transpose(p['w_up'], (1, 0, 2, 3))[:, :, ::-1, ::-1]  # OIHW, flipped
    y = lax.conv_general_dilated(
        x1, w_t, window_strides=(1, 1), padding=((1, 2), (1, 2)),
        lhs_dilation=(2, 2), dimension_numbers=('NCHW', 'OIHW', 'NCHW'))
    y = bn_relu(y, p['b_up'], p['up_gamma'], p['up_beta'], p['up_mean'], p['up_var'])

    z = lax.conv_general_dilated(
        x2, p['w_br'], window_strides=(1, 1), padding='VALID',
        dimension_numbers=('NCHW', 'OIHW', 'NCHW'))
    z = bn_relu(z, p['b_br'], p['br_gamma'], p['br_beta'], p['br_mean'], p['br_var'])

    diffX = z.shape[2] - y.shape[2]
    diffY = z.shape[3] - y.shape[3]
    y = jnp.pad(y, ((0, 0), (0, 0), (0, diffX), (0, diffY)))
    return y + z


if __name__ == "__main__":
    key = jax.random.PRNGKey(0)
    k1, k2, k3, k4, kp = jax.random.split(key, 5)

    N, in_ch, bridge_ch, out_ch = 2, 4, 6, 8
    params = init_params(kp, in_ch, bridge_ch, out_ch)
    fwd = jax.jit(up_forward)

    # case 1: exact 2x upsample (diff == 0)
    x1 = jax.random.normal(k1, (N, in_ch, 8, 8), jnp.float32)
    x2 = jax.random.normal(k2, (N, bridge_ch, 16, 16), jnp.float32)
    out = jax.block_until_ready(fwd(x1, x2, params))
    ref = ref_forward(x1, x2, params)
    assert out.shape == ref.shape == (N, out_ch, 16, 16)
    if not jnp.allclose(out, ref, atol=5e-2, rtol=5e-2):
        raise AssertionError("Pallas output does not match reference (case 1)")

    # case 2: exercises the F.pad (bottom/right) path, diffX = diffY = 2
    x1b = jax.random.normal(k3, (N, in_ch, 7, 7), jnp.float32)
    x2b = jax.random.normal(k4, (N, bridge_ch, 16, 16), jnp.float32)
    outb = jax.block_until_ready(fwd(x1b, x2b, params))
    refb = ref_forward(x1b, x2b, params)
    assert outb.shape == refb.shape == (N, out_ch, 16, 16)
    if not jnp.allclose(outb, refb, atol=5e-2, rtol=5e-2):
        raise AssertionError("Pallas output does not match reference (case 2)")

    print("KERNEL_OK")
</pallas_src>

<mosaic_0001>
module attributes {stable_mosaic.version = 11 : i64} {
  func.func @_fused_up_kernel(%arg0: i32, %arg1: i32, %arg2: memref<1x9x9x4xbf16, #tpu.memory_space<vmem>>, %arg3: memref<8x2x8x12xbf16, #tpu.memory_space<vmem>>, %arg4: memref<2x2x4x32xbf16, #tpu.memory_space<vmem>>, %arg5: memref<12x16xbf16, #tpu.memory_space<vmem>>, %arg6: memref<1x16xf32, #tpu.memory_space<vmem>>, %arg7: memref<1x16xf32, #tpu.memory_space<vmem>>, %arg8: memref<1x16xf32, #tpu.memory_space<vmem>>, %arg9: memref<1x16xf32, #tpu.memory_space<vmem>>, %arg10: memref<8x2x8x16xf32, #tpu.memory_space<vmem>>) attributes {dimension_semantics = [#tpu.dimension_semantics<parallel>, #tpu.dimension_semantics<parallel>], iteration_bounds = array<i64: 2, 1>, scalar_prefetch = 0 : i64, scratch_operands = 0 : i64, tpu.core_type = #tpu.core_type<tc>, window_params = [{transform_indices = @transform_0, window_bounds = array<i64: 1, 9, 9, 4>}, {transform_indices = @transform_1, window_bounds = array<i64: 8, 2, 8, 12>}, {pipeline_mode = #tpu.pipeline_mode<synchronous>, transform_indices = @transform_2, window_bounds = array<i64: 2, 2, 4, 32>}, {pipeline_mode = #tpu.pipeline_mode<synchronous>, transform_indices = @transform_3, window_bounds = array<i64: 12, 16>}, {pipeline_mode = #tpu.pipeline_mode<synchronous>, transform_indices = @transform_4, window_bounds = array<i64: 1, 16>}, {pipeline_mode = #tpu.pipeline_mode<synchronous>, transform_indices = @transform_5, window_bounds = array<i64: 1, 16>}, {pipeline_mode = #tpu.pipeline_mode<synchronous>, transform_indices = @transform_6, window_bounds = array<i64: 1, 16>}, {pipeline_mode = #tpu.pipeline_mode<synchronous>, transform_indices = @transform_7, window_bounds = array<i64: 1, 16>}, {transform_indices = @transform_8, window_bounds = array<i64: 8, 2, 8, 16>}]} {
    %c8_i32 = arith.constant 8 : i32
    %0 = arith.muli %arg1, %c8_i32 : i32
    %1 = tpu.assume_multiple %0, 8 : i32
    %c0 = arith.constant 0 : index
    %2 = arith.index_cast %1 : i32 to index
    %c0_0 = arith.constant 0 : index
    %c0_1 = arith.constant 0 : index
    %3 = vector.load %arg2[%c0, %2, %c0_0, %c0_1] : memref<1x9x9x4xbf16, #tpu.memory_space<vmem>>, vector<1x9x9x4xbf16>
    %4 = vector.shape_cast %3 : vector<1x9x9x4xbf16> to vector<9x9x4xbf16>
    %5 = vector.extract_strided_slice %4 {offsets = [0, 0, 0], sizes = [8, 8, 4], strides = [1, 1, 1]} : vector<9x9x4xbf16> to vector<8x8x4xbf16>
    %6 = vector.shape_cast %5 : vector<8x8x4xbf16> to vector<64x4xbf16>
    %c0_2 = arith.constant 0 : index
    %c0_3 = arith.constant 0 : index
    %c0_4 = arith.constant 0 : index
    %c0_5 = arith.constant 0 : index
    %7 = vector.load %arg4[%c0_2, %c0_3, %c0_4, %c0_5] : memref<2x2x4x32xbf16, #tpu.memory_space<vmem>>, vector<1x1x4x32xbf16>
    %8 = vector.shape_cast %7 : vector<1x1x4x32xbf16> to vector<4x32xbf16>
    %cst = arith.constant dense<0.000000e+00> : vector<64x32xf32>
    %9 = tpu.matmul %6, %8, %cst {dimension_numbers = #tpu.dot_dimension_numbers<[1], [0], [0], [1], [0, 0, 1, 1], [], []>} : vector<64x4xbf16>, vector<4x32xbf16>, vector<64x32xf32> -> vector<64x32xf32>
    %10 = vector.extract_strided_slice %4 {offsets = [0, 1, 0], sizes = [8, 8, 4], strides = [1, 1, 1]} : vector<9x9x4xbf16> to vector<8x8x4xbf16>
    %11 = vector.shape_cast %10 : vector<8x8x4xbf16> to vector<64x4xbf16>
    %c0_6 = arith.constant 0 : index
    %c1 = arith.constant 1 : index
    %c0_7 = arith.constant 0 : index
    %c0_8 = arith.constant 0 : index
    %12 = vector.load %arg4[%c0_6, %c1, %c0_7, %c0_8] : memref<2x2x4x32xbf16, #tpu.memory_space<vmem>>, vector<1x1x4x32xbf16>
    %13 = vector.shape_cast %12 : vector<1x1x4x32xbf16> to vector<4x32xbf16>
    %cst_9 = arith.constant dense<0.000000e+00> : vector<64x32xf32>
    %14 = tpu.matmul %11, %13, %cst_9 {dimension_numbers = #tpu.dot_dimension_numbers<[1], [0], [0], [1], [0, 0, 1, 1], [], []>} : vector<64x4xbf16>, vector<4x32xbf16>, vector<64x32xf32> -> vector<64x32xf32>
    %15 = arith.addf %9, %14 : vector<64x32xf32>
    %16 = vector.extract_strided_slice %4 {offsets = [1, 0, 0], sizes = [8, 8, 4], strides = [1, 1, 1]} : vector<9x9x4xbf16> to vector<8x8x4xbf16>
    %17 = vector.shape_cast %16 : vector<8x8x4xbf16> to vector<64x4xbf16>
    %c1_10 = arith.constant 1 : index
    %c0_11 = arith.constant 0 : index
    %c0_12 = arith.constant 0 : index
    %c0_13 = arith.constant 0 : index
    %18 = vector.load %arg4[%c1_10, %c0_11, %c0_12, %c0_13] : memref<2x2x4x32xbf16, #tpu.memory_space<vmem>>, vector<1x1x4x32xbf16>
    %19 = vector.shape_cast %18 : vector<1x1x4x32xbf16> to vector<4x32xbf16>
    %cst_14 = arith.constant dense<0.000000e+00> : vector<64x32xf32>
    %20 = tpu.matmul %17, %19, %cst_14 {dimension_numbers = #tpu.dot_dimension_numbers<[1], [0], [0], [1], [0, 0, 1, 1], [], []>} : vector<64x4xbf16>, vector<4x32xbf16>, vector<64x32xf32> -> vector<64x32xf32>
    %21 = arith.addf %15, %20 : vector<64x32xf32>
    %22 = vector.extract_strided_slice %4 {offsets = [1, 1, 0], sizes = [8, 8, 4], strides = [1, 1, 1]} : vector<9x9x4xbf16> to vector<8x8x4xbf16>
    %23 = vector.shape_cast %22 : vector<8x8x4xbf16> to vector<64x4xbf16>
    %c1_15 = arith.constant 1 : index
    %c1_16 = arith.constant 1 : index
    %c0_17 = arith.constant 0 : index
    %c0_18 = arith.constant 0 : index
    %24 = vector.load %arg4[%c1_15, %c1_16, %c0_17, %c0_18] : memref<2x2x4x32xbf16, #tpu.memory_space<vmem>>, vector<1x1x4x32xbf16>
    %25 = vector.shape_cast %24 : vector<1x1x4x32xbf16> to vector<4x32xbf16>
    %cst_19 = arith.constant dense<0.000000e+00> : vector<64x32xf32>
    %26 = tpu.matmul %23, %25, %cst_19 {dimension_numbers = #tpu.dot_dimension_numbers<[1], [0], [0], [1], [0, 0, 1, 1], [], []>} : vector<64x4xbf16>, vector<4x32xbf16>, vector<64x32xf32> -> vector<64x32xf32>
    %27 = arith.addf %21, %26 : vector<64x32xf32>
    %c0_20 = arith.constant 0 : index
    %c0_21 = arith.constant 0 : index
    %28 = vector.load %arg6[%c0_20, %c0_21] : memref<1x16xf32, #tpu.memory_space<vmem>>, vector<1x16xf32>
    %c0_22 = arith.constant 0 : index
    %c0_23 = arith.constant 0 : index
    %29 = vector.load %arg7[%c0_22, %c0_23] : memref<1x16xf32, #tpu.memory_space<vmem>>, vector<1x16xf32>
    %c0_24 = arith.constant 0 : index
    %c0_25 = arith.constant 0 : index
    %30 = vector.load %arg8[%c0_24, %c0_25] : memref<1x16xf32, #tpu.memory_space<vmem>>, vector<1x16xf32>
    %c0_26 = arith.constant 0 : index
    %c0_27 = arith.constant 0 : index
    %31 = vector.load %arg9[%c0_26, %c0_27] : memref<1x16xf32, #tpu.memory_space<vmem>>, vector<1x16xf32>
    %32 = vector.extract_strided_slice %27 {offsets = [0, 0], sizes = [64, 16], strides = [1, 1]} : vector<64x32xf32> to vector<64x16xf32>
    %33 = vector.broadcast %28 : vector<1x16xf32> to vector<64x16xf32>
    %34 = arith.mulf %32, %33 : vector<64x16xf32>
    %35 = vector.broadcast %29 : vector<1x16xf32> to vector<64x16xf32>
    %36 = arith.addf %34, %35 : vector<64x16xf32>
    %cst_28 = arith.constant 0.000000e+00 : f32
    %37 = vector.broadcast %cst_28 : f32 to vector<64x16xf32>
    %38 = arith.maximumf %36, %37 : vector<64x16xf32>
    %c0_29 = arith.constant 0 : index
    %c0_30 = arith.constant 0 : index
    %c0_31 = arith.constant 0 : index
    %c0_32 = arith.constant 0 : index
    %39 = vector.load %arg3[%c0_29, %c0_30, %c0_31, %c0_32] : memref<8x2x8x12xbf16, #tpu.memory_space<vmem>>, vector<8x1x8x12xbf16>
    %40 = vector.shape_cast %39 : vector<8x1x8x12xbf16> to vector<8x8x12xbf16>
    %41 = vector.shape_cast %40 : vector<8x8x12xbf16> to vector<64x12xbf16>
    %c0_33 = arith.constant 0 : index
    %c0_34 = arith.constant 0 : index
    %42 = vector.load %arg5[%c0_33, %c0_34] : memref<12x16xbf16, #tpu.memory_space<vmem>>, vector<12x16xbf16>
    %cst_35 = arith.constant dense<0.000000e+00> : vector<64x16xf32>
    %43 = tpu.matmul %41, %42, %cst_35 {dimension_numbers = #tpu.dot_dimension_numbers<[1], [0], [0], [1], [0, 0, 1, 1], [], []>} : vector<64x12xbf16>, vector<12x16xbf16>, vector<64x16xf32> -> vector<64x16xf32>
    %44 = vector.broadcast %30 : vector<1x16xf32> to vector<64x16xf32>
    %45 = arith.mulf %43, %44 : vector<64x16xf32>
    %46 = vector.broadcast %31 : vector<1x16xf32> to vector<64x16xf32>
    %47 = arith.addf %45, %46 : vector<64x16xf32>
    %cst_36 = arith.constant 0.000000e+00 : f32
    %48 = vector.broadcast %cst_36 : f32 to vector<64x16xf32>
    %49 = arith.maximumf %47, %48 : vector<64x16xf32>
    %50 = arith.addf %38, %49 : vector<64x16xf32>
    %51 = vector.shape_cast %50 : vector<64x16xf32> to vector<8x8x16xf32>
    %c0_37 = arith.constant 0 : index
    %c0_38 = arith.constant 0 : index
    %c0_39 = arith.constant 0 : index
    %c0_40 = arith.constant 0 : index
    %52 = vector.load %arg10[%c0_37, %c0_38, %c0_39, %c0_40] : memref<8x2x8x16xf32, #tpu.memory_space<vmem>>, vector<8x1x8x16xf32>
    %53 = vector.shape_cast %52 : vector<8x1x8x16xf32> to vector<8x8x16xf32>
    %54 = vector.shape_cast %51 : vector<8x8x16xf32> to vector<8x1x8x16xf32>
    tpu.vector_store %arg10[%c0_37, %c0_38, %c0_39, %c0_40], %54 {strides = array<i32>} : memref<8x2x8x16xf32, #tpu.memory_space<vmem>>, vector<8x1x8x16xf32>,
    %55 = vector.extract_strided_slice %27 {offsets = [0, 16], sizes = [64, 16], strides = [1, 1]} : vector<64x32xf32> to vector<64x16xf32>
    %56 = vector.broadcast %28 : vector<1x16xf32> to vector<64x16xf32>
    %57 = arith.mulf %55, %56 : vector<64x16xf32>
    %58 = vector.broadcast %29 : vector<1x16xf32> to vector<64x16xf32>
    %59 = arith.addf %57, %58 : vector<64x16xf32>
    %cst_41 = arith.constant 0.000000e+00 : f32
    %60 = vector.broadcast %cst_41 : f32 to vector<64x16xf32>
    %61 = arith.maximumf %59, %60 : vector<64x16xf32>
    %c0_42 = arith.constant 0 : index
    %c1_43 = arith.constant 1 : index
    %c0_44 = arith.constant 0 : index
    %c0_45 = arith.constant 0 : index
    %62 = vector.load %arg3[%c0_42, %c1_43, %c0_44, %c0_45] : memref<8x2x8x12xbf16, #tpu.memory_space<vmem>>, vector<8x1x8x12xbf16>
    %63 = vector.shape_cast %62 : vector<8x1x8x12xbf16> to vector<8x8x12xbf16>
    %64 = vector.shape_cast %63 : vector<8x8x12xbf16> to vector<64x12xbf16>
    %c0_46 = arith.constant 0 : index
    %c0_47 = arith.constant 0 : index
    %65 = vector.load %arg5[%c0_46, %c0_47] : memref<12x16xbf16, #tpu.memory_space<vmem>>, vector<12x16xbf16>
    %cst_48 = arith.constant dense<0.000000e+00> : vector<64x16xf32>
    %66 = tpu.matmul %64, %65, %cst_48 {dimension_numbers = #tpu.dot_dimension_numbers<[1], [0], [0], [1], [0, 0, 1, 1], [], []>} : vector<64x12xbf16>, vector<12x16xbf16>, vector<64x16xf32> -> vector<64x16xf32>
    %67 = vector.broadcast %30 : vector<1x16xf32> to vector<64x16xf32>
    %68 = arith.mulf %66, %67 : vector<64x16xf32>
    %69 = vector.broadcast %31 : vector<1x16xf32> to vector<64x16xf32>
    %70 = arith.addf %68, %69 : vector<64x16xf32>
    %cst_49 = arith.constant 0.000000e+00 : f32
    %71 = vector.broadcast %cst_49 : f32 to vector<64x16xf32>
    %72 = arith.maximumf %70, %71 : vector<64x16xf32>
    %73 = arith.addf %61, %72 : vector<64x16xf32>
    %74 = vector.shape_cast %73 : vector<64x16xf32> to vector<8x8x16xf32>
    %c0_50 = arith.constant 0 : index
    %c1_51 = arith.constant 1 : index
    %c0_52 = arith.constant 0 : index
    %c0_53 = arith.constant 0 : index
    %75 = vector.load %arg10[%c0_50, %c1_51, %c0_52, %c0_53] : memref<8x2x8x16xf32, #tpu.memory_space<vmem>>, vector<8x1x8x16xf32>
    %76 = vector.shape_cast %75 : vector<8x1x8x16xf32> to vector<8x8x16xf32>
    %77 = vector.shape_cast %74 : vector<8x8x16xf32> to vector<8x1x8x16xf32>
    tpu.vector_store %arg10[%c0_50, %c1_51, %c0_52, %c0_53], %77 {strides = array<i32>} : memref<8x2x8x16xf32, #tpu.memory_space<vmem>>, vector<8x1x8x16xf32>,
    return
  }
  func.func @transform_0(%arg0: i32, %arg1: i32) -> (i32, i32, i32, i32) {
    %c0_i32 = arith.constant 0 : i32
    %c0_i32_0 = arith.constant 0 : i32
    %c0_i32_1 = arith.constant 0 : i32
    %c0_i32_2 = arith.constant 0 : i32
    return %arg0, %c0_i32, %c0_i32_0, %c0_i32_1 : i32, i32, i32, i32
  }
  func.func @transform_1(%arg0: i32, %arg1: i32) -> (i32, i32, i32, i32) {
    %c1_i32 = arith.constant 1 : i32
    %0 = arith.muli %arg0, %c1_i32 : i32
    %1 = arith.addi %0, %arg1 : i32
    %c0_i32 = arith.constant 0 : i32
    %c0_i32_0 = arith.constant 0 : i32
    %c0_i32_1 = arith.constant 0 : i32
    %c0_i32_2 = arith.constant 0 : i32
    return %1, %c0_i32, %c0_i32_0, %c0_i32_1 : i32, i32, i32, i32
  }
  func.func @transform_2(%arg0: i32, %arg1: i32) -> (i32, i32, i32, i32) {
    %c0_i32 = arith.constant 0 : i32
    %c0_i32_0 = arith.constant 0 : i32
    %c0_i32_1 = arith.constant 0 : i32
    %c0_i32_2 = arith.constant 0 : i32
    %c0_i32_3 = arith.constant 0 : i32
    return %c0_i32, %c0_i32_0, %c0_i32_1, %c0_i32_2 : i32, i32, i32, i32
  }
  func.func @transform_3(%arg0: i32, %arg1: i32) -> (i32, i32) {
    %c0_i32 = arith.constant 0 : i32
    %c0_i32_0 = arith.constant 0 : i32
    %c0_i32_1 = arith.constant 0 : i32
    return %c0_i32, %c0_i32_0 : i32, i32
  }
  func.func @transform_4(%arg0: i32, %arg1: i32) -> (i32, i32) {
    %c0_i32 = arith.constant 0 : i32
    %c0_i32_0 = arith.constant 0 : i32
    %c0_i32_1 = arith.constant 0 : i32
    return %c0_i32, %c0_i32_0 : i32, i32
  }
  func.func @transform_5(%arg0: i32, %arg1: i32) -> (i32, i32) {
    %c0_i32 = arith.constant 0 : i32
    %c0_i32_0 = arith.constant 0 : i32
    %c0_i32_1 = arith.constant 0 : i32
    return %c0_i32, %c0_i32_0 : i32, i32
  }
  func.func @transform_6(%arg0: i32, %arg1: i32) -> (i32, i32) {
    %c0_i32 = arith.constant 0 : i32
    %c0_i32_0 = arith.constant 0 : i32
    %c0_i32_1 = arith.constant 0 : i32
    return %c0_i32, %c0_i32_0 : i32, i32
  }
  func.func @transform_7(%arg0: i32, %arg1: i32) -> (i32, i32) {
    %c0_i32 = arith.constant 0 : i32
    %c0_i32_0 = arith.constant 0 : i32
    %c0_i32_1 = arith.constant 0 : i32
    return %c0_i32, %c0_i32_0 : i32, i32
  }
  func.func @transform_8(%arg0: i32, %arg1: i32) -> (i32, i32, i32, i32) {
    %c1_i32 = arith.constant 1 : i32
    %0 = arith.muli %arg0, %c1_i32 : i32
    %1 = arith.addi %0, %arg1 : i32
    %c0_i32 = arith.constant 0 : i32
    %c0_i32_0 = arith.constant 0 : i32
    %c0_i32_1 = arith.constant 0 : i32
    %c0_i32_2 = arith.constant 0 : i32
    return %1, %c0_i32, %c0_i32_0, %c0_i32_1 : i32, i32, i32, i32
  }
}

</mosaic_0001>

<bundles_post_ra>
// kernel: tile.39
= control target key start
LH: loop header
LB: loop body
LE: loop exit
PB: predicated region body
PF: predicated region fallthrough
CT: control target
= control target key end

     0   :  { %vm8_vm0 = vcmask 64512   ;;  %vm14_vm1 = vcmask 130112   ;;  %s42_s0 = inlined_call_operand.vmem [shape: f32[2,8], index: 0, kind: input, shape index: {}]   ;;  %s43_s1 = inlined_call_operand.vmem [shape: f32[1,16], index: 1, kind: output, shape index: {}]  }
   0x1   :  { %v5_v0 = vld [vmem:[%s42_s0] sm:$0x3]  ;;  %s25_s0 = smov 8  }
   0x2   :  { %6 = vst [vmem:[#allocation1] sm:$0x3] %v5_v0 }
   0x9   :  { %v11_v1 = vld [vmem:[#allocation1 + $0x1] sm:$0x1]   ;;  %v7_v2 = vld [vmem:[#allocation1] sm:$0x1]  }
   0xa   :  { %12 = vrot.lane.b32.xlu0 %v11_v1, %s25_s0  ;;  %9 = vst.msk [vmem:[#allocation0] sm:$0x1] %vm8_vm0, %v7_v2  }
  0x7c   :  { %v13_v3 = vpop.permute.xlu0 %12  }
  0x7d   :  { %15 = vst.msk [vmem:[#allocation0] sm:$0x1] %vm14_vm1, %v13_v3  }
  0x84   :  { %v20_v4 = vld [vmem:[#allocation0] sm:$0x1] }
  0x85   :  { %23 = vst [vmem:[%s43_s1] sm:$0x1] %v20_v4 }

// kernel: tile.38
= control target key start
LH: loop header
LB: loop body
LE: loop exit
PB: predicated region body
PF: predicated region fallthrough
CT: control target
= control target key end

     0   :  { %s22_s0 = inlined_call_operand.vmem [shape: f32[8], index: 0, kind: input, shape index: {}]   ;;  %s23_s1 = inlined_call_operand.vmem [shape: f32[2,8], index: 1, kind: output, shape index: {}]  }
   0x1   :  { %v4_v0 = vld [vmem:[%s22_s0] ss:$0 sm:$0xff] }
   0x2   :  { %5 = vst [vmem:[%s23_s1] sm:$0x3] %v4_v0 }

// kernel: up_forward.1
= control target key start
LH: loop header
LB: loop body
LE: loop exit
PB: predicated region body
PF: predicated region fallthrough
CT: control target
= control target key end

     0   :  { %s1744_s27 = smov 0   ;;  %s1746_s28 = smov 0   ;;  %s2130_s0 = inlined_call_operand.vmem [shape: bf16[2,9,9,4], index: 0, kind: input, shape index: {}]   ;;  %s2131_s1 = inlined_call_operand.vmem [shape: bf16[16,2,8,12], index: 1, kind: input, shape index: {}]   ;;  %s2132_s2 = inlined_call_operand.vmem [shape: bf16[2,2,4,32], index: 2, kind: input, shape index: {}]   ;;  %s2133_s3 = inlined_call_operand.vmem [shape: bf16[12,16], index: 3, kind: input, shape index: {}]   ;;  %s2134_s4 = inlined_call_operand.vmem [shape: f32[1,16], index: 4, kind: input, shape index: {}]   ;;  %s2135_s5 = inlined_call_operand.vmem [shape: f32[1,16], index: 5, kind: input, shape index: {}]   ;;  %s2136_s6 = inlined_call_operand.vmem [shape: f32[1,16], index: 6, kind: input, shape index: {}]   ;;  %s2137_s7 = inlined_call_operand.vmem [shape: f32[1,16], index: 7, kind: input, shape index: {}]   ;;  %s2138_s8 = inlined_call_operand.vmem [shape: f32[16,2,8,16], index: 8, kind: output, shape index: {}]  }
   0x1   :  { %s1748_s29 = smov 0  }
   0x2 LB: > { %s30_s30 = sadd.s32 1, %s1691_s28  ;;  %p1447_p0 = scmp.ge.s32.totalorder %s1695_s29, 1  ;;  %s1695_s29 = sphi %s1748_s29, %s18_s29   ;;  %s1691_s28 = sphi %s1746_s28, %s2143_s28   ;;  %s1687_s27 = sphi %s1744_s27, %s2142_s27  }
   0x3   : > { %p32_p1 = scmp.ge.s32.totalorder %s30_s30, 2  ;;  %p292_p2 = scmp.lt.s32.totalorder %s1695_s29, 3 }
   0x5   : > { %s2145_s30 = smov (%p32_p1, %s30_s30), 0  ;;  %p293_p3 = pnand %p1447_p0, %p292_p2 }
   0x6   : > { %p335_p4 = scmp.lt.s32.totalorder (!%p293_p3), %s1687_s27, 1  ;;  %s1449_s16 = sshll.u32 (!%p293_p3), %s1687_s27, 3 }
   0x7   : > { %296 = sbr.rel (%p293_p3) target bundleno = 508 (0x1fc), region = 52  ;;  %p1793_p5 = scmp.lt.s32.totalorder (!%p293_p3), %s1449_s16, 15 }
   0x8   : > { %s1697_s26 = smov (!%p293_p3), 16  }
   0xc   : > { %v381_v0 = vld [vmem:[%s2132_s2] sm:$0x3]  ;;  %vm524_vm0 = vcmask 1041408   ;;  %v1481_v2 = vld [vmem:[%s2132_s2 + $0x6] sm:$0x3]  ;;  %s336_s15 = scalar_select %p335_p4, %s1687_s27, 1 }
   0xd   : > { %1623 = vmatprep.subr.msk.bf16.mxu1 %vm524_vm0, %v381_v0  ;;  %v626_v1 = vsel %vm524_vm0, %v381_v0, 0  ;;  %v1455_v3 = vld [vmem:[%s2132_s2 + $0x2] sm:$0x3]  ;;  %vm511_vm1 = vcmask 31744   ;;  %vm382_vm2 = vsmask.f32 3328 }
   0xe   : > { %1573 = vmatpush3.bf16.msra.mxu1 %v626_v1  ;;  %1622 = vmatprep.subr.msk.bf16.mxu0 %vm524_vm0, %v1455_v3  ;;  %v526_v4 = vsel %vm524_vm0, %v1455_v3, 0  ;;  %s1628_s17 = smul.u32 72, %s336_s15  ;;  %v1472_v5 = vld [vmem:[%s2132_s2 + $0x4] sm:$0x3]  ;;  %vm986_vm3 = vcmask 1045504   ;;  %v823_v6 = vsel %vm524_vm0, %v1481_v2, 0 }
   0xf   : > { %1625 = vmatprep.subr.msk.bf16.mxu1 %vm524_vm0, %v1481_v2  ;;  %1563 = vmatpush3.bf16.msra.mxu0 %v526_v4  ;;  %vm383_vm4 = vsmask.f32 7440  ;;  %v1800_v7 = vld [vmem:[%s2134_s4] ss:$0 sm:$0xff]  ;;  %v1834_v26 = vsel %vm524_vm0, %v1472_v5, 0  ;;  %s2147_s16 = smov (!%p1793_p5, %s1449_s16), 15 }
  0x10   : > { %1624 = vmatprep.subr.msk.bf16.mxu0 %vm524_vm0, %v1472_v5  ;;  %s1788_s22 = scalar_lea.vmem %s2130_s0, %s1628_s17  ;;  %1108 = vrot.lane.b32.xlu0 %v1800_v7, %s1697_s26  ;;  %v1819_v16 = vld [vmem:[%s2133_s3] sm:$0x3f]   ;;  %vm1855_vm5 = vmor %vm382_vm2, %vm383_vm4  ;;  %s1530_s27 = sshll.u32 %s2147_s16, 3  ;;  %vm973_vm6 = vcmask 97280   ;;  %vm1099_vm7 = vcmask 130048  }
  0x11   : > { %v363_v8 = vld [vmem:[%s1788_s22] sm:$0xf]  ;;  %v1804_v9 = vld [vmem:[%s1788_s22 + $0x8] sm:$0xf]  ;;  %v1807_v10 = vld [vmem:[%s1788_s22 + $0x10] sm:$0xf]  ;;  %s1881_s13 = scalar_lea.vmem %s2131_s1, %s1530_s27 }
  0x12   : > { %v386_v11 = vshrl.u32 %v363_v8, 16  ;;  %v389_v12 = vshll.u32 %v363_v8, 16  ;;  %v400_v13 = vshrl.u32 %v1804_v9, 16  ;;  %v403_v14 = vshll.u32 %v1804_v9, 16  ;;  %v1814_v15 = vld [vmem:[%s1788_s22 + $0x18] sm:$0xf] }
  0x13   : > { %v1464_v17 = vcombine.low %v363_v8, %v1804_v9  ;;  %v1465_v18 = vcombine.low %v1807_v10, %v1814_v15  ;;  %v1825_v19 = vld [vmem:[%s1788_s22 + $0x20] sm:$0xf]  ;;  %v1828_v20 = vld [vmem:[%s1788_s22 + $0x28] sm:$0xf]  ;;  %v364_v21 = vld [vmem:[%s1788_s22 + $0x4] sm:$0x1] }
  0x14   : > { %v388_v22 = vrot.slane %v386_v11, 4  ;;  %v391_v23 = vrot.slane %v389_v12, 5  ;;  %v442_v24 = vshrl.u32 %v1825_v19, 16  ;;  %v366_v25 = vld [vmem:[%s1788_s22 + $0xc] sm:$0x1]  ;;  %v445_v27 = vshll.u32 %v1825_v19, 16 }
  0x15   : > { %1574 = vmatprep.mubr.msk.bf16.mxu1 %vm511_vm1, %v1464_v17  ;;  %v456_v28 = vshrl.u32 %v1828_v20, 16  ;;  %v459_v29 = vshll.u32 %v1828_v20, 16  ;;  %v1466_v30 = vcombine.low %v1825_v19, %v1828_v20  ;;  %v368_v31 = vld [vmem:[%s1788_s22 + $0x14] sm:$0x1]  ;;  %v370_v32 = vld [vmem:[%s1788_s22 + $0x1c] sm:$0x1] }
  0x16   : > { %1575 = vmatmul.mubr.msk.bf16.vlgmr.msra.gmra.mxu1 %vm511_vm1, %v1465_v18  ;;  %v392_v33 = vor.u32 %v391_v23, %v388_v22  ;;  %v395_v34 = vshll.u32 %v364_v21, 16  ;;  %v402_v35 = vrot.slane %v400_v13, 4  ;;  %v405_v36 = vrot.slane %v403_v14, 5  ;;  %v372_v37 = vld [vmem:[%s1788_s22 + $0x24] sm:$0x1]  ;;  %s1531_s23 = sshll.u32 %s2147_s16, 4 }
  0x17   : > { %1593 = vmatpush3.bf16.msra.mxu1 %v823_v6  ;;  %1578 = vmatprep.mubr.msk.bf16.mxu1 %vm511_vm1, %v1466_v30  ;;  %v409_v39 = vshll.u32 %v366_v25, 16  ;;  %v414_v40 = vshrl.u32 %v1807_v10, 16  ;;  %v417_v41 = vshll.u32 %v1807_v10, 16  ;;  %v423_v42 = vshll.u32 %v368_v31, 16  ;;  %v1863_v47 = vld [vmem:[%s1788_s22 + $0x30] sm:$0xf]  ;;  %s2043_s25 = scalar_lea.vmem %s2138_s8, %s1531_s23 }
  0x18   : > { %v393_v43 = vrot.slane %v392_v33, 4  ;;  %v397_v44 = vrot.slane %v395_v34, 5  ;;  %v406_v45 = vor.u32 %v405_v36, %v402_v35  ;;  %v428_v46 = vshrl.u32 %v1814_v15, 16  ;;  %1627 = vmatprep.subr.msk.bf16.mxu1 %vm986_vm3, %v1819_v16  ;;  %v1872_v60 = vld [vmem:[%s1788_s22 + $0x38] sm:$0xf] }
  0x19   : > { %v411_v48 = vrot.slane %v409_v39, 5  ;;  %v416_v49 = vrot.slane %v414_v40, 4  ;;  %v419_v50 = vrot.slane %v417_v41, 5  ;;  %v425_v51 = vrot.slane %v423_v42, 5  ;;  %v374_v1 = vld [vmem:[%s1788_s22 + $0x2c] sm:$0x1] }
  0x1a   : > { %v398_v52 = vsel %vm1855_vm5, %v393_v43, %v397_v44  ;;  %v407_v53 = vrot.slane %v406_v45, 4  ;;  %v430_v54 = vrot.slane %v428_v46, 4  ;;  %v431_v55 = vshll.u32 %v1814_v15, 16  ;;  %v376_v6 = vld [vmem:[%s1788_s22 + $0x34] sm:$0x1] }
  0x1b   : > { %v420_v56 = vor.u32 %v419_v50, %v416_v49  ;;  %v437_v57 = vshll.u32 %v370_v32, 16  ;;  %v444_v58 = vrot.slane %v442_v24, 4  ;;  %v447_v59 = vrot.slane %v445_v27, 5  ;;  %v378_v22 = vld [vmem:[%s1788_s22 + $0x3c] sm:$0x1] }
  0x1c   : > { %v412_v61 = vsel %vm1855_vm5, %v407_v53, %v411_v48  ;;  %v433_v62 = vrot.slane %v431_v55, 5  ;;  %v451_v63 = vshll.u32 %v372_v37, 16  ;;  %v470_v0 = vshrl.u32 %v1863_v47, 16  ;;  %v1894_v30 = vld [vmem:[%s1788_s22 + $0x40] sm:$0xf] }
  0x1d   : > { %v421_v2 = vrot.slane %v420_v56, 4  ;;  %v439_v3 = vrot.slane %v437_v57, 5  ;;  %v448_v4 = vor.u32 %v447_v59, %v444_v58  ;;  %v1456_v5 = vcombine.low %v398_v52, %v412_v61  ;;  %v380_v35 = vld [vmem:[%s1788_s22 + $0x44] sm:$0x1] }
  0x1e   : > { %v434_v8 = vor.u32 %v433_v62, %v430_v54  ;;  %v453_v11 = vrot.slane %v451_v63, 5  ;;  %v473_v12 = vshll.u32 %v1863_v47, 16  ;;  %v484_v13 = vshrl.u32 %v1872_v60, 16  ;;  %v1666_v43 = vld [vmem:[%s2133_s3] sm:$0x3f]  }
  0x1f   : > { %v426_v14 = vsel %vm1855_vm5, %v421_v2, %v425_v51  ;;  %v449_v17 = vrot.slane %v448_v4, 4  ;;  %1564 = vmatprep.mubr.msk.bf16.mxu0 %vm511_vm1, %v1456_v5  ;;  %v487_v18 = vshll.u32 %v1872_v60, 16  ;;  %v1467_v21 = vcombine.low %v1863_v47, %v1872_v60  ;;  %v1927_v4 = vld [vmem:[%s2135_s5] ss:$0 sm:$0xff] }
  0x20   : > { %v435_v23 = vrot.slane %v434_v8, 4  ;;  %v1482_v24 = vcombine.low %v412_v61, %v426_v14  ;;  %v458_v25 = vrot.slane %v456_v28, 4  ;;  %v461_v27 = vrot.slane %v459_v29, 5  ;;  %1119 = vrot.lane.b32.xlu0 %v1927_v4, %s1697_s26 }
  0x21   : > { %v454_v31 = vsel %vm1855_vm5, %v449_v17, %v453_v11  ;;  %1579 = vmatmul.mubr.msk.bf16.gmra.mxu1 %vm511_vm1, %v1467_v21  ;;  %v465_v32 = vshll.u32 %v374_v1, 16  ;;  %v472_v33 = vrot.slane %v470_v0, 4  ;;  %v475_v34 = vrot.slane %v473_v12, 5  ;;  %v1664_v11 = vld [vmem:[%s1881_s13 + $0x14] ss:$8 sps:$4 sm:$0xff]  }
  0x22   : > { %v440_v36 = vsel %vm1855_vm5, %v435_v23, %v439_v3  ;;  %1594 = vmatprep.mubr.msk.bf16.mxu1 %vm511_vm1, %v1482_v24  ;;  %v462_v37 = vor.u32 %v461_v27, %v458_v25  ;;  %v479_v39 = vshll.u32 %v376_v6, 16  ;;  %v486_v28 = vrot.slane %v484_v13, 4  ;;  %v1667_v12 = vld [vmem:[%s1881_s13 + $0x24] ss:$8 sps:$4 sm:$0xff]   ;;  %v1671_v13 = vld [vmem:[%s1881_s13 + $0x20] ss:$8 sps:$4 sm:$0xff]  }
  0x23   : > { %v1457_v29 = vcombine.low %v426_v14, %v440_v36  ;;  %v1483_v40 = vcombine.low %v440_v36, %v454_v31  ;;  %v467_v41 = vrot.slane %v465_v32, 5  ;;  %v476_v42 = vor.u32 %v475_v34, %v472_v33  ;;  %v1672_v14 = vld [vmem:[%s1881_s13 + $0x30] ss:$8 sps:$4 sm:$0xff]  }
  0x24   : > { %v463_v44 = vrot.slane %v462_v37, 4  ;;  %v481_v45 = vrot.slane %v479_v39, 5  ;;  %v489_v46 = vrot.slane %v487_v18, 5  ;;  %v493_v48 = vshll.u32 %v378_v22, 16 }
  0x25   : > { %1565 = vmatmul.mubr.msk.bf16.vlgmr.msra.gmra.mxu0 %vm511_vm1, %v1457_v29  ;;  %v477_v49 = vrot.slane %v476_v42, 4  ;;  %v790_v50 = vshrl.u32 %v1894_v30, 16  ;;  %v793_v51 = vshll.u32 %v1894_v30, 16  ;;  %v799_v52 = vshll.u32 %v380_v35, 16 }
  0x26   : > { %v468_v53 = vsel %vm1855_vm5, %v463_v44, %v467_v41  ;;  %v1187_v54 = vsel %vm986_vm3, %v1819_v16, 0  ;;  %v490_v55 = vor.u32 %v489_v46, %v486_v28  ;;  %v495_v56 = vrot.slane %v493_v48, 5  ;;  %1583 = vmatpush3.bf16.msra.mxu0 %v1834_v26  ;;  %v1971_v48 = vld [vmem:[%s2136_s6] ss:$0 sm:$0xff] }
  0x27   : > { %v1458_v57 = vcombine.low %v454_v31, %v468_v53  ;;  %v482_v58 = vsel %vm1855_vm5, %v477_v49, %v481_v45  ;;  %v792_v59 = vrot.slane %v790_v50, 4  ;;  %v795_v61 = vrot.slane %v793_v51, 5  ;;  %1626 = vmatprep.subr.msk.bf16.mxu0 %vm986_vm3, %v1666_v43 }
  0x28   : > { %v491_v62 = vrot.slane %v490_v55, 4  ;;  %v1484_v63 = vcombine.low %v468_v53, %v482_v58  ;;  %v801_v0 = vrot.slane %v799_v52, 5  ;;  %v1473_v1 = vcombine.low %v1804_v9, %v1807_v10  ;;  %v1662_v10 = vld [vmem:[%s1881_s13 + $0x4] ss:$8 sps:$4 sm:$0xff]  }
  0x29   : > { %1568 = vmatprep.mubr.msk.bf16.mxu0 %vm511_vm1, %v1458_v57  ;;  %1595 = vmatmul.mubr.msk.bf16.vlgmr.msra.gmra.mxu1 %vm511_vm1, %v1483_v40  ;;  %v796_v16 = vor.u32 %v795_v61, %v792_v59  ;;  %v1474_v6 = vcombine.low %v1814_v15, %v1825_v19  ;;  %v1475_v8 = vcombine.low %v1828_v20, %v1863_v47  ;;  %v988_v38 = vsel %vm986_vm3, %v1666_v43, 0  ;;  %v1668_v19 = vld [vmem:[%s1881_s13] ss:$8 sps:$4 sm:$0xff]   ;;  %v1669_v20 = vld [vmem:[%s1881_s13 + $0x34] ss:$8 sps:$4 sm:$0xff]  }
  0x2a   : > { %1613 = vmatpush3.bf16.msra.mxu1 %v1187_v54  ;;  %v496_v26 = vsel %vm1855_vm5, %v491_v62, %v495_v56  ;;  %1598 = vmatprep.mubr.msk.bf16.mxu1 %vm511_vm1, %v1484_v63  ;;  %v1476_v15 = vcombine.low %v1872_v60, %v1894_v30  ;;  %v1670_v47 = vld [vmem:[%s1881_s13 + $0x10] ss:$8 sps:$4 sm:$0xff]   ;;  %v1976_v56 = vld [vmem:[%s2137_s7] ss:$0 sm:$0xff] }
  0x2b   : > { %v1459_v2 = vcombine.low %v482_v58, %v496_v26  ;;  %v797_v3 = vrot.slane %v796_v16, 4 }
  0x2d   : > { %1569 = vmatmul.mubr.msk.bf16.gmra.mxu0 %vm511_vm1, %v1459_v2  ;;  %v802_v5 = vsel %vm1855_vm5, %v797_v3, %v801_v0 }
  0x2e   : > { %1584 = vmatprep.mubr.msk.bf16.mxu0 %vm511_vm1, %v1473_v1  ;;  %v1485_v9 = vcombine.low %v496_v26, %v802_v5 }
  0x31   : > { %1599 = vmatmul.mubr.msk.bf16.gmra.mxu1 %vm511_vm1, %v1485_v9 }
  0x32   : > { %1614 = vmatprep.mubr.msk.bf16.mxu1 %vm973_vm6, %v1662_v10 }
  0x35   : > { %1585 = vmatmul.mubr.msk.bf16.vlgmr.msra.gmra.mxu0 %vm511_vm1, %v1474_v6 }
  0x36   : > { %1588 = vmatprep.mubr.msk.bf16.mxu0 %vm511_vm1, %v1475_v8  ;;  %1603 = vmatpush3.bf16.msra.mxu0 %v988_v38 }
  0x39   : > { %1615 = vmatmul.mubr.msk.bf16.vlgmr.msra.gmra.mxu1 %vm973_vm6, %v1664_v11 }
  0x3a   : > { %1618 = vmatprep.mubr.msk.bf16.mxu1 %vm973_vm6, %v1667_v12 }
  0x3d   : > { %1589 = vmatmul.mubr.msk.bf16.gmra.mxu0 %vm511_vm1, %v1476_v15 }
  0x3e   : > { %1604 = vmatprep.mubr.msk.bf16.mxu0 %vm973_vm6, %v1668_v19 }
  0x41   : > { %1619 = vmatmul.mubr.msk.bf16.gmra.mxu1 %vm973_vm6, %v1669_v20 }
  0x45   : > { %1605 = vmatmul.mubr.msk.bf16.vlgmr.msra.gmra.mxu0 %vm973_vm6, %v1670_v47 }
  0x46   : > { %1608 = vmatprep.mubr.msk.bf16.mxu0 %vm973_vm6, %v1671_v13 }
  0x4d   : > { %1609 = vmatmul.mubr.msk.bf16.gmra.mxu0 %vm973_vm6, %v1672_v14 }
  0xd6   : > { %v1576_v60 = vpop.f32.mrf.mxu1 }
  0xd8   : > { %v662_v17 = vpop.f32.mrf.mxu1 }
  0xda   : > { %v1577_v18 = vpop.f32.mrf.mxu1 }
  0xdc   : > { %v665_v21 = vpop.f32.mrf.mxu1 }
  0xe1   : > { %v1580_v22 = vpop.f32.mrf.mxu1 }
  0xe3   : > { %v678_v23 = vpop.f32.mrf.mxu1 }
  0xe5   : > { %v1566_v24 = vpop.f32.mrf.mxu0  ;;  %v1581_v25 = vpop.f32.mrf.mxu1 }
  0xe6   : > { %v671_v44 = vadd.f32 %v1576_v60, %v1566_v24 }
  0xe7   : > { %v562_v27 = vpop.f32.mrf.mxu0  ;;  %v1962_v30 = vpop.f32.mrf.mxu1 }
  0xe8   : > { %v663_v49 = vadd.f32 %v662_v17, %v562_v27 }
  0xe9   : > { %v1567_v31 = vpop.f32.mrf.mxu0  ;;  %v1596_v32 = vpop.f32.mrf.mxu1 }
  0xea   : > { %v674_v50 = vadd.f32 %v1577_v18, %v1567_v31 }
  0xeb   : > { %v565_v33 = vpop.f32.mrf.mxu0  ;;  %v859_v34 = vpop.f32.mrf.mxu1 }
  0xec   : > { %v666_v58 = vadd.f32 %v665_v21, %v565_v33 }
  0xed   : > { %v1570_v35 = vpop.f32.mrf.mxu0  ;;  %v1597_v36 = vpop.f32.mrf.mxu1 }
  0xee   : > { %v687_v62 = vadd.f32 %v1580_v22, %v1570_v35 }
  0xef   : > { %v578_v37 = vpop.f32.mrf.mxu0  ;;  %v862_v39 = vpop.f32.mrf.mxu1 }
  0xf0   : > { %v679_v3 = vadd.f32 %v678_v23, %v578_v37 }
  0xf1   : > { %v1571_v28 = vpop.f32.mrf.mxu0  ;;  %v1600_v29 = vpop.f32.mrf.mxu1 }
  0xf2   : > { %v690_v21 = vadd.f32 %v1581_v25, %v1571_v28 }
  0xf3   : > { %v581_v40 = vpop.f32.mrf.mxu0  ;;  %v875_v41 = vpop.f32.mrf.mxu1 }
  0xf4   : > { %v682_v33 = vadd.f32 %v1962_v30, %v581_v40 }
  0xf5   : > { %v1586_v42 = vpop.f32.mrf.mxu0  ;;  %v1964_v43 = vpop.f32.mrf.mxu1 }
  0xf6   : > { %v783_v51 = vadd.f32 %v1586_v42, %v671_v44 }
  0xf7   : > { %v750_v45 = vpop.f32.mrf.mxu0  ;;  %v1966_v46 = vpop.f32.mrf.mxu1 }
  0xf8   : > { %v781_v54 = vadd.f32 %v750_v45, %v663_v49  ;;  %v1979_v63 = vadd.f32 %v1596_v32, %v783_v51 }
  0xf9   : > { %v1587_v52 = vpop.f32.mrf.mxu0  ;;  %v1616_v53 = vpop.f32.mrf.mxu1 }
  0xfa   : > { %v784_v55 = vadd.f32 %v1587_v52, %v674_v50  ;;  %v1256_v57 = vmul.f32 %v1616_v53, %v1971_v48  ;;  %v1983_v5 = vadd.f32 %v859_v34, %v781_v54  ;;  %v910_v47 = vmul.f32 %v1800_v7, %v1979_v63 }
  0xfb   : > { %v753_v59 = vpop.f32.mrf.mxu0  ;;  %v1223_v61 = vpop.f32.mrf.mxu1 }
  0xfc   : > { %v782_v16 = vadd.f32 %v753_v59, %v666_v58  ;;  %v1264_v0 = vadd.f32 %v1976_v56, %v1256_v57  ;;  %v1254_v1 = vmul.f32 %v1971_v48, %v1223_v61  ;;  %v1985_v9 = vadd.f32 %v1597_v36, %v784_v55 }
  0xfd   : > { %v1590_v26 = vpop.f32.mrf.mxu0  ;;  %v1617_v2 = vpop.f32.mrf.mxu1  ;;  %v908_v22 = vmul.f32 %v1800_v7, %v1983_v5  ;;  %v924_v35 = vadd.f32 %v1927_v4, %v910_v47 }
  0xfe   : > { %v787_v10 = vadd.f32 %v1590_v26, %v687_v62  ;;  %v1987_v6 = vadd.f32 %v862_v39, %v782_v16  ;;  %v1272_v8 = vmax.f32 %v1264_v0, 0.0  ;;  %v1257_v11 = vmul.f32 %v1617_v2, %v1971_v48 }
  0xff   : > { %v766_v38 = vpop.f32.mrf.mxu0  ;;  %v1226_v12 = vpop.f32.mrf.mxu1  ;;  %v1262_v15 = vadd.f32 %v1976_v56, %v1254_v1  ;;  %v911_v24 = vmul.f32 %v1800_v7, %v1985_v9  ;;  %v932_v59 = vmax.f32 %v924_v35, 0.0 }
 0x100   : > { %v1991_v19 = vadd.f32 %v1600_v29, %v787_v10  ;;  %v785_v20 = vadd.f32 %v766_v38, %v679_v3  ;;  %v1265_v13 = vadd.f32 %v1976_v56, %v1257_v11  ;;  %v1255_v60 = vmul.f32 %v1971_v48, %v1226_v12  ;;  %1290 = vrot.lane.b32.xlu0 %v1272_v8, %s1697_s26 }
 0x101   : > { %v1591_v14 = vpop.f32.mrf.mxu0  ;;  %v1620_v17 = vpop.f32.mrf.mxu1  ;;  %v1270_v18 = vmax.f32 %v1262_v15, 0.0  ;;  %v909_v27 = vmul.f32 %v1800_v7, %v1987_v6  ;;  %v925_v40 = vadd.f32 %v1927_v4, %v911_v24 }
 0x102   : > { %v2000_v23 = vadd.f32 %v875_v41, %v785_v20  ;;  %v914_v25 = vmul.f32 %v1800_v7, %v1991_v19  ;;  %v788_v34 = vadd.f32 %v1591_v14, %v690_v21  ;;  %v1273_v36 = vmax.f32 %v1265_v13, 0.0 }
 0x103   : > { %v769_v31 = vpop.f32.mrf.mxu0  ;;  %1286 = vrot.lane.b32.xlu1 %v1270_v18, %s1697_s26  ;;  %v1239_v32 = vpop.f32.mrf.mxu1  ;;  %v1263_v37 = vadd.f32 %v1976_v56, %v1255_v60  ;;  %v1260_v39 = vmul.f32 %v1620_v17, %v1971_v48  ;;  %v922_v41 = vadd.f32 %v1927_v4, %v908_v22  ;;  %v2019_v44 = vadd.f32 %v1927_v4, %v909_v27 }
 0x104   : > { %v912_v42 = vmul.f32 %v1800_v7, %v2000_v23  ;;  %v786_v45 = vadd.f32 %v769_v31, %v682_v33  ;;  %v1258_v49 = vmul.f32 %v1971_v48, %v1239_v32  ;;  %v2024_v51 = vadd.f32 %v1927_v4, %v914_v25 }
 0x105   : > { %v1606_v28 = vpop.f32.mrf.mxu0  ;;  %v1621_v29 = vpop.f32.mrf.mxu1  ;;  %v2027_v52 = vadd.f32 %v1964_v43, %v788_v34  ;;  %v1271_v57 = vmax.f32 %v1263_v37, 0.0  ;;  %v1268_v58 = vadd.f32 %v1976_v56, %v1260_v39  ;;  %v930_v11 = vmax.f32 %v922_v41, 0.0 }
 0x106   : > { %v1063_v30 = vmul.f32 %v1606_v28, %v1971_v48  ;;  %v1266_v61 = vadd.f32 %v1976_v56, %v1258_v49  ;;  %v926_v16 = vadd.f32 %v1927_v4, %v912_v42  ;;  %v2038_v1 = vadd.f32 %v1966_v46, %v786_v45 }
 0x107   : > { %v1024_v50 = vpop.f32.mrf.mxu0  ;;  %1292 = vrot.lane.b32.xlu1 %v1273_v36, %s1697_s26  ;;  %v1242_v55 = vpop.f32.mrf.mxu1  ;;  %v1261_v3 = vmul.f32 %v1621_v29, %v1971_v48  ;;  %v915_v15 = vmul.f32 %v1800_v7, %v2027_v52  ;;  %v1276_v20 = vmax.f32 %v1268_v58, 0.0  ;;  %v933_v17 = vmax.f32 %v925_v40, 0.0 }
 0x108   : > { %v1077_v53 = vadd.f32 %v1976_v56, %v1063_v30  ;;  %v1061_v54 = vmul.f32 %v1971_v48, %v1024_v50  ;;  %v1274_v2 = vmax.f32 %v1266_v61, 0.0  ;;  %v1259_v10 = vmul.f32 %v1971_v48, %v1242_v55 }
 0x109   : > { %v1607_v62 = vpop.f32.mrf.mxu0  ;;  %v913_v22 = vmul.f32 %v1800_v7, %v2038_v1  ;;  %v1269_v24 = vadd.f32 %v1976_v56, %v1261_v3  ;;  %v929_v35 = vadd.f32 %v1927_v4, %v915_v15  ;;  %v931_v36 = vmax.f32 %v2019_v44, 0.0 }
 0x10a   : > { %v1085_v0 = vmax.f32 %v1077_v53, 0.0  ;;  %v1075_v26 = vadd.f32 %v1976_v56, %v1061_v54  ;;  %v1064_v43 = vmul.f32 %v1607_v62, %v1971_v48  ;;  %v1267_v47 = vadd.f32 %v1976_v56, %v1259_v10  ;;  %1294 = vrot.lane.b32.xlu0 %v1274_v2, %s1697_s26 }
 0x10b   : > { %v1027_v8 = vpop.f32.mrf.mxu0  ;;  %1288 = vrot.lane.b32.xlu1 %v1271_v57, %s1697_s26  ;;  %v936_v39 = vmax.f32 %v2024_v51, 0.0  ;;  %v927_v42 = vadd.f32 %v1927_v4, %v913_v22  ;;  %v1277_v30 = vmax.f32 %v1269_v24, 0.0  ;;  %v934_v44 = vmax.f32 %v926_v16, 0.0 }
 0x10c   : > { %v1093_v38 = vadd.f32 %v1085_v0, %v932_v59  ;;  %v1083_v12 = vmax.f32 %v1075_v26, 0.0  ;;  %v1078_v46 = vadd.f32 %v1976_v56, %v1064_v43  ;;  %v1062_v13 = vmul.f32 %v1971_v48, %v1027_v8 }
 0x10d   : > { %v1610_v14 = vpop.f32.mrf.mxu0  ;;  %v1275_v27 = vmax.f32 %v1267_v47, 0.0  ;;  %v937_v54 = vmax.f32 %v929_v35, 0.0  ;;  %v935_v59 = vmax.f32 %v927_v42, 0.0 }
 0x10e   : > { %1102 = vst.msk [vmem:[%s2043_s25 + $0x20] sm:$0xff] %vm1099_vm7, %v1093_v38  ;;  %v1091_v60 = vadd.f32 %v1083_v12, %v930_v11  ;;  %v1086_v18 = vmax.f32 %v1078_v46, 0.0  ;;  %v1067_v21 = vmul.f32 %v1610_v14, %v1971_v48  ;;  %v1076_v31 = vadd.f32 %v1976_v56, %v1062_v13  ;;  %1298 = vrot.lane.b32.xlu0 %v1276_v20, %s1697_s26 }
 0x10f   : > { %v1040_v32 = vpop.f32.mrf.mxu0  ;;  %1296 = vrot.lane.b32.xlu1 %v1275_v27, %s1697_s26 }
 0x110   : > { %1100 = vst.msk [vmem:[%s2043_s25] sm:$0xff] %vm1099_vm7, %v1091_v60  ;;  %v1094_v33 = vadd.f32 %v1086_v18, %v933_v17  ;;  %v1081_v25 = vadd.f32 %v1976_v56, %v1067_v21  ;;  %v1065_v34 = vmul.f32 %v1971_v48, %v1040_v32  ;;  %v1084_v37 = vmax.f32 %v1076_v31, 0.0 }
 0x111   : > { %v1611_v7 = vpop.f32.mrf.mxu0 }
 0x112   : > { %1103 = vst.msk [vmem:[%s2043_s25 + $0x30] sm:$0xff] %vm1099_vm7, %v1094_v33  ;;  %v1089_v28 = vmax.f32 %v1081_v25, 0.0  ;;  %v1079_v29 = vadd.f32 %v1976_v56, %v1065_v34  ;;  %v1068_v41 = vmul.f32 %v1611_v7, %v1971_v48  ;;  %v1092_v40 = vadd.f32 %v1084_v37, %v931_v36 }
 0x113   : > { %v1043_v45 = vpop.f32.mrf.mxu0  ;;  %1300 = vrot.lane.b32.xlu1 %v1277_v30, %s1697_s26  ;;  %s1698_s26 = smov 112  }
 0x114   : > { %v1097_v49 = vadd.f32 %v1089_v28, %v936_v39  ;;  %v1087_v50 = vmax.f32 %v1079_v29, 0.0  ;;  %v1082_v53 = vadd.f32 %v1976_v56, %v1068_v41  ;;  %v1066_v51 = vmul.f32 %v1971_v48, %v1043_v45  ;;  %1101 = vst.msk [vmem:[%s2043_s25 + $0x10] sm:$0xff] %vm1099_vm7, %v1092_v40  ;;  %v1109_v48 = vpop.permute.xlu0 %1108 }
 0x115   : > { %v1113_v16 = vmul.f32 %v1109_v48, %v1979_v63  ;;  %v1111_v26 = vmul.f32 %v1109_v48, %v1983_v5  ;;  %v1114_v2 = vmul.f32 %v1109_v48, %v1985_v9  ;;  %v1112_v8 = vmul.f32 %v1109_v48, %v1987_v6 }
 0x116   : > { %1106 = vst.msk [vmem:[%s2043_s25 + $0x60] sm:$0xff] %vm1099_vm7, %v1097_v49  ;;  %v1095_v4 = vadd.f32 %v1087_v50, %v934_v44  ;;  %v1090_v55 = vmax.f32 %v1082_v53, 0.0  ;;  %v1080_v57 = vadd.f32 %v1976_v56, %v1066_v51  ;;  %v1115_v46 = vmul.f32 %v1109_v48, %v2000_v23 }
 0x117   : > { %v1117_v9 = vmul.f32 %v1109_v48, %v1991_v19  ;;  %v1116_v13 = vmul.f32 %v1109_v48, %v2038_v1  ;;  %v1118_v23 = vmul.f32 %v1109_v48, %v2027_v52 }
 0x118   : > { %1104 = vst.msk [vmem:[%s2043_s25 + $0x40] sm:$0xff] %vm1099_vm7, %v1095_v4  ;;  %v1098_v58 = vadd.f32 %v1090_v55, %v937_v54  ;;  %v1088_v61 = vmax.f32 %v1080_v57, 0.0  ;;  %v1120_v0 = vpop.permute.xlu0 %1119 }
 0x119   : > { %v1124_v43 = vadd.f32 %v1120_v0, %v1113_v16  ;;  %v1122_v3 = vadd.f32 %v1120_v0, %v1111_v26  ;;  %v1125_v11 = vadd.f32 %v1120_v0, %v1114_v2  ;;  %v1123_v5 = vadd.f32 %v1120_v0, %v1112_v8 }
 0x11a   : > { %1107 = vst.msk [vmem:[%s2043_s25 + $0x70] sm:$0xff] %vm1099_vm7, %v1098_v58  ;;  %v1096_v62 = vadd.f32 %v1088_v61, %v935_v59  ;;  %v1126_v6 = vadd.f32 %v1120_v0, %v1115_v46  ;;  %v1128_v22 = vadd.f32 %v1120_v0, %v1117_v9  ;;  %v1127_v24 = vadd.f32 %v1120_v0, %v1116_v13 }
 0x11b   : > { %v1132_v56 = vmax.f32 %v1124_v43, 0.0  ;;  %v1130_v15 = vmax.f32 %v1122_v3, 0.0  ;;  %v1133_v20 = vmax.f32 %v1125_v11, 0.0  ;;  %v1131_v60 = vmax.f32 %v1123_v5, 0.0 }
 0x11c   : > { %1105 = vst.msk [vmem:[%s2043_s25 + $0x50] sm:$0xff] %vm1099_vm7, %v1096_v62  ;;  %v1134_v21 = vmax.f32 %v1126_v6, 0.0  ;;  %v1136_v19 = vmax.f32 %v1128_v22, 0.0  ;;  %v1135_v1 = vmax.f32 %v1127_v24, 0.0  ;;  %v1129_v32 = vadd.f32 %v1120_v0, %v1118_v23 }
 0x11e   : > { %v1137_v35 = vmax.f32 %v1129_v32, 0.0 }
 0x172   : > { %v1291_v10 = vpop.permute.xlu0 %1290 }
 0x173   : > { %v1312_v38 = vadd.f32 %v1291_v10, %v1132_v56 }
 0x175   : > { %v1287_v12 = vpop.permute.xlu1 %1286  ;;  %1330 = vrot.lane.b32.xlu0 %v1312_v38, %s1698_s26 }
 0x176   : > { %v1310_v63 = vadd.f32 %v1287_v12, %v1130_v15 }
 0x179   : > { %v1293_v47 = vpop.permute.xlu1 %1292  ;;  %1326 = vrot.lane.b32.xlu0 %v1310_v63, %s1698_s26 }
 0x17a   : > { %v1313_v14 = vadd.f32 %v1293_v47, %v1133_v20 }
 0x17c   : > { %1332 = vrot.lane.b32.xlu1 %v1313_v14, %s1698_s26  ;;  %v1295_v27 = vpop.permute.xlu0 %1294 }
 0x17d   : > { %v1289_v17 = vpop.permute.xlu1 %1288  ;;  %v1314_v31 = vadd.f32 %v1295_v27, %v1134_v21 }
 0x17e   : > { %v1311_v18 = vadd.f32 %v1289_v17, %v1131_v60 }
 0x17f   : > { %1334 = vrot.lane.b32.xlu0 %v1314_v31, %s1698_s26 }
 0x180   : > { %1328 = vrot.lane.b32.xlu1 %v1311_v18, %s1698_s26  ;;  %v1299_v33 = vpop.permute.xlu0 %1298 }
 0x181   : > { %v1297_v25 = vpop.permute.xlu1 %1296  ;;  %v1316_v52 = vadd.f32 %v1299_v33, %v1136_v19 }
 0x182   : > { %v1315_v34 = vadd.f32 %v1297_v25, %v1135_v1 }
 0x183   : > { %1338 = vrot.lane.b32.xlu0 %v1316_v52, %s1698_s26 }
 0x184   : > { %1336 = vrot.lane.b32.xlu1 %v1315_v34, %s1698_s26 }
 0x185   : > { %v1301_v36 = vpop.permute.xlu1 %1300 }
 0x186   : > { %v1317_v37 = vadd.f32 %v1301_v36, %v1137_v35 }
 0x188   : > { %1340 = vrot.lane.b32.xlu1 %v1317_v37, %s1698_s26 }
 0x1e7   : > { %v1331_v7 = vpop.permute.xlu0 %1330 }
 0x1e8   : > { %1522 = vst.msk [vmem:[%s2043_s25 + $0x28] sm:$0xff] %vm1099_vm7, %v1331_v7 }
 0x1eb   : > { %v1327_v39 = vpop.permute.xlu0 %1326 }
 0x1ec   : > { %1520 = vst.msk [vmem:[%s2043_s25 + $0x8] sm:$0xff] %vm1099_vm7, %v1327_v39 }
 0x1ee   : > { %v1333_v28 = vpop.permute.xlu1 %1332 }
 0x1ef   : > { %1523 = vst.msk [vmem:[%s2043_s25 + $0x38] sm:$0xff] %vm1099_vm7, %v1333_v28 }
 0x1f1   : > { %v1335_v41 = vpop.permute.xlu0 %1334 }
 0x1f2   : > { %v1329_v29 = vpop.permute.xlu1 %1328  ;;  %1524 = vst.msk [vmem:[%s2043_s25 + $0x48] sm:$0xff] %vm1099_vm7, %v1335_v41 }
 0x1f3   : > { %1521 = vst.msk [vmem:[%s2043_s25 + $0x18] sm:$0xff] %vm1099_vm7, %v1329_v29 }
 0x1f5   : > { %v1339_v42 = vpop.permute.xlu0 %1338 }
 0x1f6   : > { %v1337_v30 = vpop.permute.xlu1 %1336  ;;  %1526 = vst.msk [vmem:[%s2043_s25 + $0x68] sm:$0xff] %vm1099_vm7, %v1339_v42 }
 0x1f7   : > { %1525 = vst.msk [vmem:[%s2043_s25 + $0x58] sm:$0xff] %vm1099_vm7, %v1337_v30 }
 0x1fa   : > { %v1341_v40 = vpop.permute.xlu1 %1340 }
 0x1fb   : > { %1527 = vst.msk [vmem:[%s2043_s25 + $0x78] sm:$0xff] %vm1099_vm7, %v1341_v40 }
 0x1fc PF: > { %s18_s29 = sadd.s32 1, %s1695_s29   ;;  %s2142_s27 = smov %s1691_s28 }
 0x1fd   : > { %p15_p6 = scmp.ge.s32.totalorder %s18_s29, 4   ;;  %s2143_s28 = smov %s2145_s30 }
 0x1ff   :  { %17 = sbr.rel (!%p15_p6) target bundleno = 2 (0x2), region = 91 }

</bundles_post_ra>
